<compile_context>
chip_gen: v5e
topology: v5e:2x2
jax: 0.10.0
libtpu: 0.0.40
codegen_flags: <defaults>
</compile_context>

<pallas_src>
import jax
import jax.numpy as jnp
from jax.experimental import pallas as pl
from jax.experimental.pallas import tpu as pltpu

EPS = 1e-5


# ----------------------------- sizing helpers -----------------------------

def _padded_bytes(shape, itemsize=4):
    """Bytes of an f32 VMEM allocation after (8, 128) tile padding."""
    s = [int(d) for d in shape]
    if len(s) >= 2:
        s[-2] = -(-s[-2] // 8) * 8
    if len(s) >= 1:
        s[-1] = -(-s[-1] // 128) * 128
    n = 1
    for d in s:
        n *= d
    return n * itemsize


def _vmem_capacity_bytes():
    try:
        return int(pltpu.get_tpu_info().vmem_capacity_bytes)
    except Exception:
        return 64 * 2 ** 20  # v7x physical per-TC; safe lower bound elsewhere


def _tile_footprint_bytes(ht, W, Cin, Cout):
    """(8,128)-padded VMEM footprint of one pipelined grid step."""
    WCI, WCO = W * Cin, W * Cout
    fb = 0
    fb += 2 * _padded_bytes((1, 1, ht + 2, WCI))      # double-buffered input window
    fb += 2 * _padded_bytes((3, WCI, WCO))            # banded weights
    fb += 6 * _padded_bytes((1, WCO))                 # bias / scale / shift rows
    fb += 2 * _padded_bytes((1, ht, WCO))             # double-buffered output block
    fb += 2 * _padded_bytes((1, 1, 2, WCO))           # stats block
    fb += 6 * _padded_bytes((ht, WCO))                # live f32 working values
    fb += 2 * _padded_bytes((ht + 2, WCI))
    return fb


def _pick_h_tile(H, W, Cin, Cout, budget_bytes):
    """Largest row tile that fits the VMEM budget (full image preferred)."""
    if _tile_footprint_bytes(H, W, Cin, Cout) <= budget_bytes:
        return H
    best = None
    if (W * Cout) % 128 == 0:
        for ht in range(8, H, 8):
            if H % ht == 0 and _tile_footprint_bytes(ht, W, Cin, Cout) <= budget_bytes:
                best = ht
    return best if best is not None else H


# --------------------------------- kernels ---------------------------------

def _conv3x3_rows(x, wband_ref, brow_ref, ht):
    """x: (ht+2, W*Cin) zero-padded rows -> (ht, W*Cout) conv + bias, f32.

    The 3 kw taps and the left/right zero padding live inside the banded
    weight matrices; the 3 kh taps are plain row slices of the halo window.
    """
    acc = jnp.dot(x[0:ht, :], wband_ref[0], preferred_element_type=jnp.float32)
    acc = acc + jnp.dot(x[1:ht + 1, :], wband_ref[1],
                        preferred_element_type=jnp.float32)
    acc = acc + jnp.dot(x[2:ht + 2, :], wband_ref[2],
                        preferred_element_type=jnp.float32)
    return acc + brow_ref[...]


def _stats_kernel(xw_ref, wband_ref, brow_ref, stats_ref):
    """Pass 1: conv(+bias) on one row tile -> lane-dense partial (sum, sum_sq).

    xw_ref:    (1, 1, HT+2, W*Cin)   halo window for this (n, h) tile
    wband_ref: (3, W*Cin, W*Cout)    banded conv weights (kh-indexed)
    brow_ref:  (1, W*Cout)           conv bias tiled over w
    stats_ref: (1, 1, 2, W*Cout)     [sum, sum_sq] over the tile's rows
    """
    ht = xw_ref.shape[2] - 2
    acc = _conv3x3_rows(xw_ref[0, 0], wband_ref, brow_ref, ht)
    psum = jnp.sum(acc, axis=0, keepdims=True)
    psq = jnp.sum(acc * acc, axis=0, keepdims=True)
    stats_ref[0, 0] = jnp.concatenate([psum, psq], axis=0)


def _conv_bn_relu_kernel(xw_ref, wband_ref, brow_ref, scale_ref, shift_ref,
                         o_ref):
    """Pass 2: recompute conv (cheap, MXU idle) then y = max(x*scale+shift, 0)."""
    ht = o_ref.shape[1]
    acc = _conv3x3_rows(xw_ref[0, 0], wband_ref, brow_ref, ht)
    o_ref[0] = jnp.maximum(acc * scale_ref[...] + shift_ref[...], 0.0)


# --------------------------------- wrapper ---------------------------------

def conv_block_forward(x_nchw, w_oihw, bias, gamma, beta, h_tile=None):
    """ConvBlock forward. x_nchw: (N, Cin, H, W) f32 -> (N, Cout, H, W) f32."""
    N, Cin, H, W = x_nchw.shape
    Cout = w_oihw.shape[0]
    WCI, WCO = W * Cin, W * Cout
    f32 = jnp.float32
    isz = 4

    cap = _vmem_capacity_bytes()
    budget = (3 * cap) // 8  # leave pipeline / compiler headroom
    HT = h_tile if h_tile is not None else _pick_h_tile(H, W, Cin, Cout, budget)
    assert H % HT == 0, "h_tile must divide H"
    if HT != H:
        assert HT % 8 == 0 and WCO % 128 == 0, \
            "row-tiled path needs 8-aligned tiles and 128-aligned W*Cout"
    GH = H // HT

    # ---- layout glue (plain JAX, one time): lane-dense (W*C)-major ----------
    x_flat = jnp.transpose(x_nchw, (0, 2, 3, 1)).reshape(N, H, WCI)
    x_pad = jnp.pad(x_flat, ((0, 0), (1, 1), (0, 0)))           # top/bottom zeros
    if GH == 1:
        x_win = x_pad[:, None, :, :]                            # (N, 1, H+2, WCI)
    else:
        ridx = jnp.arange(GH)[:, None] * HT + jnp.arange(HT + 2)[None, :]
        x_win = x_pad[:, ridx, :]                               # (N, GH, HT+2, WCI)

    # Banded weights: Wband[kh][w_in*Cin+ci, w_out*Cout+co] =
    #   w[co, ci, kh, w_in-w_out+1] if |w_in - w_out| <= 1 else 0.
    wt = jnp.transpose(w_oihw, (2, 3, 1, 0)).astype(f32)        # (3, 3, Cin, Cout)
    wi = jnp.arange(W)[:, None]
    wo = jnp.arange(W)[None, :]
    kw = jnp.arange(3)[:, None, None]
    sel = (wi[None, :, :] == wo[None, :, :] + kw - 1).astype(f32)   # (3, W, W)
    wband = jnp.einsum("kab,hkio->haibo", sel, wt).reshape(3, WCI, WCO)
    brow = jnp.tile(bias.astype(f32), W).reshape(1, WCO)

    tile_bytes = _tile_footprint_bytes(HT, W, Cin, Cout)
    vmem_limit = int(min(max(2 * tile_bytes, 4 * 2 ** 20), (7 * cap) // 8))
    band_flops = 6 * N * H * WCI * WCO  # 3 banded matmuls per row

    # ------------- Pass 1: conv + per-tile partial BN statistics -------------
    stats = pl.pallas_call(
        _stats_kernel,
        out_shape=jax.ShapeDtypeStruct((N, GH, 2, WCO), f32),
        grid_spec=pltpu.PrefetchScalarGridSpec(
            num_scalar_prefetch=0,
            grid=(N, GH),
            in_specs=[
                pl.BlockSpec((1, 1, HT + 2, WCI), lambda n, h: (n, h, 0, 0)),
                pl.BlockSpec((3, WCI, WCO), lambda n, h: (0, 0, 0)),
                pl.BlockSpec((1, WCO), lambda n, h: (0, 0)),
            ],
            out_specs=pl.BlockSpec((1, 1, 2, WCO), lambda n, h: (n, h, 0, 0)),
        ),
        compiler_params=pltpu.CompilerParams(
            dimension_semantics=("parallel", "parallel"),
            vmem_limit_bytes=vmem_limit,
        ),
        cost_estimate=pl.CostEstimate(
            flops=band_flops,
            transcendentals=0,
            bytes_accessed=isz * (N * GH * (HT + 2) * WCI + 3 * WCI * WCO
                                  + WCO + N * GH * 2 * WCO),
        ),
    )(x_win, wband, brow)

    # -------- Global BN stats -> fused per-channel scale/shift (tiny) --------
    tot = jnp.sum(stats, axis=(0, 1)).reshape(2, W, Cout).sum(axis=1)  # (2, Cout)
    m = float(N * H * W)
    mean = tot[0] / m
    var = jnp.maximum(tot[1] / m - mean * mean, 0.0)   # biased var (train-mode BN)
    scale = gamma.astype(f32) * jax.lax.rsqrt(var + EPS)
    shift = beta.astype(f32) - mean * scale
    scale_row = jnp.tile(scale, W).reshape(1, WCO)
    shift_row = jnp.tile(shift, W).reshape(1, WCO)

    # ----- Pass 2: recompute conv, y = max(conv*scale + shift, 0), store -----
    out_slab = pl.pallas_call(
        _conv_bn_relu_kernel,
        out_shape=jax.ShapeDtypeStruct((N, H, WCO), f32),
        grid_spec=pltpu.PrefetchScalarGridSpec(
            num_scalar_prefetch=0,
            grid=(N, GH),
            in_specs=[
                pl.BlockSpec((1, 1, HT + 2, WCI), lambda n, h: (n, h, 0, 0)),
                pl.BlockSpec((3, WCI, WCO), lambda n, h: (0, 0, 0)),
                pl.BlockSpec((1, WCO), lambda n, h: (0, 0)),
                pl.BlockSpec((1, WCO), lambda n, h: (0, 0)),
                pl.BlockSpec((1, WCO), lambda n, h: (0, 0)),
            ],
            out_specs=pl.BlockSpec((1, HT, WCO), lambda n, h: (n, h, 0)),
        ),
        compiler_params=pltpu.CompilerParams(
            dimension_semantics=("parallel", "parallel"),
            vmem_limit_bytes=vmem_limit,
        ),
        cost_estimate=pl.CostEstimate(
            flops=band_flops + 3 * N * H * WCO,
            transcendentals=0,
            bytes_accessed=isz * (N * GH * (HT + 2) * WCI + 3 * WCI * WCO
                                  + 3 * WCO + N * H * WCO),
        ),
    )(x_win, wband, brow, scale_row, shift_row)

    out = out_slab.reshape(N, H, W, Cout)
    return jnp.transpose(out, (0, 3, 1, 2))


# -------------------------------- reference --------------------------------

def reference_forward(x_nchw, w_oihw, bias, gamma, beta):
    """Pure-JAX reference matching PyTorch Conv2d + BatchNorm2d(train) + ReLU."""
    y = jax.lax.conv_general_dilated(
        x_nchw, w_oihw, window_strides=(1, 1), padding=((1, 1), (1, 1)),
        dimension_numbers=("NCHW", "OIHW", "NCHW"))
    y = y + bias.reshape(1, -1, 1, 1)
    mean = jnp.mean(y, axis=(0, 2, 3), keepdims=True)
    var = jnp.mean((y - mean) ** 2, axis=(0, 2, 3), keepdims=True)  # biased var
    y = (y - mean) * jax.lax.rsqrt(var + EPS)
    y = y * gamma.reshape(1, -1, 1, 1) + beta.reshape(1, -1, 1, 1)
    return jnp.maximum(y, 0.0)


if __name__ == "__main__":
    # Small shapes consistent with the module: in_channels=4, out_channels=8.
    N, Cin, H, W, Cout = 2, 4, 16, 16, 8

    key = jax.random.PRNGKey(0)
    kx, kwt, kb, kg, kbe = jax.random.split(key, 5)

    x = jax.random.normal(kx, (N, Cin, H, W), dtype=jnp.float32)
    fan_in = Cin * 3 * 3
    bound = 1.0 / (fan_in ** 0.5)
    w = jax.random.uniform(kwt, (Cout, Cin, 3, 3), jnp.float32, -bound, bound)
    b = jax.random.uniform(kb, (Cout,), jnp.float32, -bound, bound)
    gamma = 1.0 + 0.1 * jax.random.normal(kg, (Cout,), jnp.float32)
    beta = 0.1 * jax.random.normal(kbe, (Cout,), jnp.float32)

    ref = reference_forward(x, w, b, gamma, beta)

    # Default tiling: at this size the whole image is one grid step (HT = H).
    out = jax.block_until_ready(conv_block_forward(x, w, b, gamma, beta))
    assert out.shape == (N, Cout, H, W)
    err = float(jnp.max(jnp.abs(out - ref)))
    assert jnp.allclose(out, ref, atol=1e-4, rtol=1e-4), err

    # Row-tiled path: exercises GH > 1 halo windows and cross-tile BN stats.
    out_t = jax.block_until_ready(
        conv_block_forward(x, w, b, gamma, beta, h_tile=8))
    err_t = float(jnp.max(jnp.abs(out_t - ref)))
    assert jnp.allclose(out_t, ref, atol=1e-4, rtol=1e-4), err_t

    print("KERNEL_OK")
</pallas_src>

<mosaic_0001>
module attributes {stable_mosaic.version = 11 : i64} {
  func.func @_stats_kernel(%arg0: i32, %arg1: i32, %arg2: memref<1x1x18x64xf32, #tpu.memory_space<vmem>>, %arg3: memref<3x64x128xf32, #tpu.memory_space<vmem>>, %arg4: memref<1x128xf32, #tpu.memory_space<vmem>>, %arg5: memref<1x1x2x128xf32, #tpu.memory_space<vmem>>) attributes {dimension_semantics = [#tpu.dimension_semantics<parallel>, #tpu.dimension_semantics<parallel>], iteration_bounds = array<i64: 2, 1>, scalar_prefetch = 0 : i64, scratch_operands = 0 : i64, tpu.core_type = #tpu.core_type<tc>, window_params = [{transform_indices = @transform_0, window_bounds = array<i64: 1, 1, 18, 64>}, {pipeline_mode = #tpu.pipeline_mode<synchronous>, transform_indices = @transform_1, window_bounds = array<i64: 3, 64, 128>}, {pipeline_mode = #tpu.pipeline_mode<synchronous>, transform_indices = @transform_2, window_bounds = array<i64: 1, 128>}, {transform_indices = @transform_3, window_bounds = array<i64: 1, 1, 2, 128>}]} {
    %c0 = arith.constant 0 : index
    %c0_0 = arith.constant 0 : index
    %c0_1 = arith.constant 0 : index
    %c0_2 = arith.constant 0 : index
    %0 = vector.load %arg2[%c0, %c0_0, %c0_1, %c0_2] : memref<1x1x18x64xf32, #tpu.memory_space<vmem>>, vector<1x1x18x64xf32>
    %1 = vector.shape_cast %0 : vector<1x1x18x64xf32> to vector<18x64xf32>
    %2 = vector.extract_strided_slice %1 {offsets = [0, 0], sizes = [16, 64], strides = [1, 1]} : vector<18x64xf32> to vector<16x64xf32>
    %c0_3 = arith.constant 0 : index
    %c0_4 = arith.constant 0 : index
    %c0_5 = arith.constant 0 : index
    %3 = vector.load %arg3[%c0_3, %c0_4, %c0_5] : memref<3x64x128xf32, #tpu.memory_space<vmem>>, vector<1x64x128xf32>
    %4 = vector.shape_cast %3 : vector<1x64x128xf32> to vector<64x128xf32>
    %cst = arith.constant dense<0.000000e+00> : vector<16x128xf32>
    %5 = tpu.matmul %2, %4, %cst {dimension_numbers = #tpu.dot_dimension_numbers<[1], [0], [0], [1], [0, 0, 1, 1], [], []>} : vector<16x64xf32>, vector<64x128xf32>, vector<16x128xf32> -> vector<16x128xf32>
    %6 = vector.extract_strided_slice %1 {offsets = [1, 0], sizes = [16, 64], strides = [1, 1]} : vector<18x64xf32> to vector<16x64xf32>
    %c1 = arith.constant 1 : index
    %c0_6 = arith.constant 0 : index
    %c0_7 = arith.constant 0 : index
    %7 = vector.load %arg3[%c1, %c0_6, %c0_7] : memref<3x64x128xf32, #tpu.memory_space<vmem>>, vector<1x64x128xf32>
    %8 = vector.shape_cast %7 : vector<1x64x128xf32> to vector<64x128xf32>
    %cst_8 = arith.constant dense<0.000000e+00> : vector<16x128xf32>
    %9 = tpu.matmul %6, %8, %cst_8 {dimension_numbers = #tpu.dot_dimension_numbers<[1], [0], [0], [1], [0, 0, 1, 1], [], []>} : vector<16x64xf32>, vector<64x128xf32>, vector<16x128xf32> -> vector<16x128xf32>
    %10 = arith.addf %5, %9 : vector<16x128xf32>
    %11 = vector.extract_strided_slice %1 {offsets = [2, 0], sizes = [16, 64], strides = [1, 1]} : vector<18x64xf32> to vector<16x64xf32>
    %c2 = arith.constant 2 : index
    %c0_9 = arith.constant 0 : index
    %c0_10 = arith.constant 0 : index
    %12 = vector.load %arg3[%c2, %c0_9, %c0_10] : memref<3x64x128xf32, #tpu.memory_space<vmem>>, vector<1x64x128xf32>
    %13 = vector.shape_cast %12 : vector<1x64x128xf32> to vector<64x128xf32>
    %cst_11 = arith.constant dense<0.000000e+00> : vector<16x128xf32>
    %14 = tpu.matmul %11, %13, %cst_11 {dimension_numbers = #tpu.dot_dimension_numbers<[1], [0], [0], [1], [0, 0, 1, 1], [], []>} : vector<16x64xf32>, vector<64x128xf32>, vector<16x128xf32> -> vector<16x128xf32>
    %15 = arith.addf %10, %14 : vector<16x128xf32>
    %c0_12 = arith.constant 0 : index
    %c0_13 = arith.constant 0 : index
    %16 = vector.load %arg4[%c0_12, %c0_13] : memref<1x128xf32, #tpu.memory_space<vmem>>, vector<1x128xf32>
    %17 = vector.broadcast %16 : vector<1x128xf32> to vector<16x128xf32>
    %18 = arith.addf %15, %17 : vector<16x128xf32>
    %cst_14 = arith.constant dense<0.000000e+00> : vector<128xf32>
    %19 = vector.multi_reduction <add>, %18, %cst_14 [0] : vector<16x128xf32> to vector<128xf32>
    %20 = vector.shape_cast %19 : vector<128xf32> to vector<1x128xf32>
    %21 = arith.mulf %18, %18 : vector<16x128xf32>
    %cst_15 = arith.constant dense<0.000000e+00> : vector<128xf32>
    %22 = vector.multi_reduction <add>, %21, %cst_15 [0] : vector<16x128xf32> to vector<128xf32>
    %23 = vector.shape_cast %22 : vector<128xf32> to vector<1x128xf32>
    %24 = tpu.concatenate %20, %23 in 0 : vector<1x128xf32>, vector<1x128xf32> -> vector<2x128xf32>
    %c0_16 = arith.constant 0 : index
    %c0_17 = arith.constant 0 : index
    %c0_18 = arith.constant 0 : index
    %c0_19 = arith.constant 0 : index
    %25 = vector.load %arg5[%c0_16, %c0_17, %c0_18, %c0_19] : memref<1x1x2x128xf32, #tpu.memory_space<vmem>>, vector<1x1x2x128xf32>
    %26 = vector.shape_cast %25 : vector<1x1x2x128xf32> to vector<2x128xf32>
    %27 = vector.shape_cast %24 : vector<2x128xf32> to vector<1x1x2x128xf32>
    tpu.vector_store %arg5[%c0_16, %c0_17, %c0_18, %c0_19], %27 {strides = array<i32>} : memref<1x1x2x128xf32, #tpu.memory_space<vmem>>, vector<1x1x2x128xf32>,
    return
  }
  func.func @transform_0(%arg0: i32, %arg1: i32) -> (i32, i32, i32, i32) {
    %c0_i32 = arith.constant 0 : i32
    %c0_i32_0 = arith.constant 0 : i32
    %c0_i32_1 = arith.constant 0 : i32
    return %arg0, %arg1, %c0_i32, %c0_i32_0 : i32, i32, i32, i32
  }
  func.func @transform_1(%arg0: i32, %arg1: i32) -> (i32, i32, i32) {
    %c0_i32 = arith.constant 0 : i32
    %c0_i32_0 = arith.constant 0 : i32
    %c0_i32_1 = arith.constant 0 : i32
    %c0_i32_2 = arith.constant 0 : i32
    return %c0_i32, %c0_i32_0, %c0_i32_1 : i32, i32, i32
  }
  func.func @transform_2(%arg0: i32, %arg1: i32) -> (i32, i32) {
    %c0_i32 = arith.constant 0 : i32
    %c0_i32_0 = arith.constant 0 : i32
    %c0_i32_1 = arith.constant 0 : i32
    return %c0_i32, %c0_i32_0 : i32, i32
  }
  func.func @transform_3(%arg0: i32, %arg1: i32) -> (i32, i32, i32, i32) {
    %c0_i32 = arith.constant 0 : i32
    %c0_i32_0 = arith.constant 0 : i32
    %c0_i32_1 = arith.constant 0 : i32
    return %arg0, %arg1, %c0_i32, %c0_i32_0 : i32, i32, i32, i32
  }
}

</mosaic_0001>

<bundles_post_ra>
// kernel: tpu_custom_call.1
= control target key start
LH: loop header
LB: loop body
LE: loop exit
PB: predicated region body
PF: predicated region fallthrough
CT: control target
= control target key end

     0   :  { %8 = vsyncpa [#allocation3], 0  ;;  %s820_s0 = inlined_call_operand.vmem [shape: f32[2,1,18,64], index: 0, kind: input, shape index: {}]   ;;  %s821_s1 = inlined_call_operand.hbm [shape: f32[3,64,128], index: 1, kind: input, shape index: {}]   ;;  %s822_s2 = inlined_call_operand.vmem [shape: f32[1,128], index: 2, kind: input, shape index: {}]   ;;  %s823_s3 = inlined_call_operand.hbm [shape: f32[2,1,2,128], index: 3, kind: output, shape index: {}]  }
   0x1   :  { %9 = vsyncpa [#allocation4], 0 }
   0x2   :  { %11 = vsyncpa [#allocation4 + $0x1], 0  ;;  %s707_s12 = smov 0   ;;  %s709_s13 = smov 0  }
   0x3   :  { %s711_s14 = smov 0   ;;  %s713_s15 = smov 0  }
   0x4   :  { %s715_s16 = smov 0   ;;  %s717_s17 = smov 0  }
   0x5 LB: > { %s473_s18 = sadd.s32 4294967295, %s682_s17   ;;  %s474_s19 = sadd.s32 4294967294, %s682_s17   ;;  %s682_s17 = sphi %s717_s17, %s17_s17   ;;  %s678_s16 = sphi %s715_s16, %s830_s16   ;;  %s674_s15 = sphi %s713_s15, %s829_s15   ;;  %s670_s14 = sphi %s711_s14, %s828_s14   ;;  %s666_s13 = sphi %s709_s13, %s827_s13   ;;  %s662_s12 = sphi %s707_s12, %s826_s12  }
   0x6   : > { %s29_s20 = sadd.s32 1, %s678_s16  ;;  %s108_s21 = sadd.s32 1, %s670_s14 }
   0x7   : > { %p31_p0 = scmp.ge.s32.totalorder %s29_s20, 2  ;;  %p118_p1 = scmp.ne.s32.totalorder %s670_s14, %s666_s13 }
   0x8   : > { %p119_p2 = scmp.eq.s32.totalorder %s473_s18, 1  ;;  %p124_p3 = scmp.ne.s32.totalorder %s666_s13, %s662_s12 }
   0x9   : > { %s832_s20 = smov (%p31_p0, %s29_s20), 0  ;;  %p125_p5 = scmp.eq.s32.totalorder %s474_s19, 1 }
   0xa   : > { %p747_p4 = por %p119_p2, %p118_p1  ;;  %s103_s23 = ssub.s32 %s678_s16, %s832_s20 }
   0xb   : > { %p475_p6 = scmp.ge.s32.totalorder %s682_s17, 1  ;;  %p106_p7 = scmp.eq.s32.totalorder %s103_s23, 0 }
   0xc   : > { %p754_p8 = por %p125_p5, %p124_p3  ;;  %p132_p9 = scmp.lt.s32.totalorder %s682_s17, 3 }
   0xd   : > { %s760_s25 = scalar_select %p106_p7, %s670_s14, %s108_s21  }
   0xe   : > { %p133_p10 = pnand %p475_p6, %p132_p9  ;;  %p515_p11 = scmp.eq.s32.totalorder %s473_s18, 0 }
   0xf   : > { %s143_s28 = sshll.u32 %s821_s1, 4  ;;  %s684_s29 = smov [#allocation2]   ;;  %s144_s28 = int_to_ptr.hbm [resolvable:$true] %s143_s28 }
  0x10   : > { %p507_p12 = pneg %p133_p10  ;;  %s145_s30 = sshll.u32 %s684_s29, 4  ;;  %s146_s30 = int_to_ptr.vmem [resolvable:$true] %s145_s30 }
  0x11   : > { %s685_s4 = smov 128   ;;  %s686_s5 = smov 8  }
  0x12   : > { %p508_p13 = pnand %p515_p11, %p507_p12  ;;  %176 = sbr.rel (%p133_p10) target bundleno = 204 (0xcc), region = 32 }
  0x14   : > { %510 = dma.hbm_to_vmem [thread:$0]  (!%p508_p13), %s144_s28, 3072, %s146_s30, [#allocation3], %s685_s4, %s685_s4, %s686_s5  }
  0x17   : > { %653 = dma.done.wait (%p515_p11), [#allocation3], 3072  }
  0x18   : > { %655 = vsyncadd (%p515_p11), [#allocation3], 4294964224  ;;  %p205_p0 = scmp.lt.s32.totalorder %s674_s15, 1  ;;  %v306_v0 = vld [vmem:[#allocation2 + $0xb8] sm:$0xff]  ;;  %v305_v1 = vld [vmem:[#allocation2 + $0xb0] sm:$0xff]  ;;  %vm307_vm0 = vcmask 1045504  }
  0x19   : > { %v233_v2 = vld [vmem:[#allocation2 + $0x78] sm:$0xff]  ;;  %325 = vmatpush.msra.mxu2 %v306_v0  ;;  %v232_v4 = vld [vmem:[#allocation2 + $0x70] sm:$0xff]  ;;  %v304_v5 = vld [vmem:[#allocation2 + $0xa8] sm:$0xff]  ;;  %vm237_vm1 = vcmask 1046528   ;;  %vm243_vm2 = vcmask 523264   ;;  %s202_s19 = sand.u32 1, %s666_s13  }
  0x1a   : > { %s206_s6 = scalar_select %p205_p0, %s674_s15, 1  ;;  %256 = vmatpush.msra.mxu0 %v233_v2  ;;  %v224_v3 = vld [vmem:[#allocation2 + $0x38] sm:$0xff]  ;;  %492 = vmatpush.msra.mxu3 %v233_v2  ;;  %v223_v6 = vld [vmem:[#allocation2 + $0x30] sm:$0xff]  ;;  %v231_v7 = vld [vmem:[#allocation2 + $0x68] sm:$0xff]  ;;  %vm364_vm3 = vcmask 1040384  }
  0x1b   : > { %283 = vmatpush.msra.mxu1 %v224_v3  ;;  %326 = vmatpush.msra.mxu2 %v305_v1  ;;  %v222_v8 = vld [vmem:[#allocation2 + $0x28] sm:$0xff]  ;;  %v303_v9 = vld [vmem:[#allocation2 + $0xa0] sm:$0xff]  ;;  %v302_v12 = vld [vmem:[#allocation2 + $0x98] sm:$0xff]  ;;  %s480_s21 = sshll.u32 %s202_s19, 1  ;;  %s489_s23 = sshll.u32 %s674_s15, 1 }
  0x1c   : > { %s500_s7 = smul.u32 24, %s206_s6  ;;  %257 = vmatpush.msra.mxu0 %v232_v4  ;;  %493 = vmatpush.msra.mxu3 %v232_v4  ;;  %v230_v10 = vld [vmem:[#allocation2 + $0x60] sm:$0xff]  ;;  %v229_v13 = vld [vmem:[#allocation2 + $0x58] sm:$0xff]  ;;  %v301_v17 = vld [vmem:[#allocation2 + $0x90] sm:$0xff]  ;;  %s379_s28 = scalar_lea.hbm %s823_s3, %s489_s23 }
  0x1d   : > { %284 = vmatpush.msra.mxu1 %v223_v6  ;;  %327 = vmatpush.msra.mxu2 %v304_v5  ;;  %v221_v11 = vld [vmem:[#allocation2 + $0x20] sm:$0xff]  ;;  %v220_v15 = vld [vmem:[#allocation2 + $0x18] sm:$0xff]  ;;  %v228_v18 = vld [vmem:[#allocation2 + $0x50] sm:$0xff]  ;;  %s204_s29 = scalar_lea.vmem [#allocation5], %s480_s21  ;;  %s383_s4 = sshll.u32 %s379_s28, 4  ;;  %s384_s4 = int_to_ptr.hbm [resolvable:$true] %s383_s4 }
  0x1e   : > { %s213_s10 = scalar_lea.vmem %s820_s0, %s500_s7  ;;  %258 = vmatpush.msra.mxu0 %v231_v7  ;;  %494 = vmatpush.msra.mxu3 %v231_v7  ;;  %v219_v19 = vld [vmem:[#allocation2 + $0x10] sm:$0xff]  ;;  %v300_v23 = vld [vmem:[#allocation2 + $0x88] sm:$0xff]  ;;  %v299_v28 = vld [vmem:[#allocation2 + $0x80] sm:$0xff]  ;;  %s381_s30 = sshll.u32 %s204_s29, 4  ;;  %s382_s30 = int_to_ptr.vmem [resolvable:$true] %s381_s30 }
  0x1f   : > { %285 = vmatpush.msra.mxu1 %v222_v8  ;;  %v214_v14 = vld [vmem:[%s213_s10] sm:$0xff]  ;;  %328 = vmatpush.msra.mxu2 %v303_v9  ;;  %v215_v16 = vld [vmem:[%s213_s10 + $0x8] sm:$0xff]  ;;  %v216_v22 = vld [vmem:[%s213_s10 + $0x10] sm:$0x3]  ;;  %s368_s15 = scalar_lea.sflag [#allocation4], %s202_s19  ;;  %s614_s5 = sshra.s32 %s384_s4, 4  ;;  %s615_s5 = int_to_ptr.hbm [resolvable:$true] %s614_s5 }
  0x20   : > { %259 = vmatpush.msra.mxu0 %v230_v10  ;;  %495 = vmatpush.msra.mxu3 %v230_v10  ;;  %v308_v20 = vrot.slane %v214_v14, 2  ;;  %v309_v21 = vrot.slane %v215_v16, 2  ;;  %v227_v24 = vld [vmem:[#allocation2 + $0x48] sm:$0xff]  ;;  %v238_v25 = vrot.slane %v214_v14, 1  ;;  %v239_v26 = vrot.slane %v215_v16, 1  ;;  %v226_v29 = vld [vmem:[#allocation2 + $0x40] sm:$0xff]  ;;  %p621_p5 = scmp.lt.s32.totalorder %s615_s5, %s823_s3 }
  0x21   : > { %286 = vmatpush.msra.mxu1 %v221_v11  ;;  %329 = vmatpush.msra.mxu2 %v302_v12  ;;  %v218_v27 = vld [vmem:[#allocation2 + $0x8] sm:$0xff]  ;;  %v241_v30 = vrot.slane %v216_v22, 1  ;;  %v217_v32 = vld [vmem:[#allocation2] sm:$0xff]  ;;  %v311_v35 = vrot.slane %v216_v22, 2  ;;  %s616_s6 = scalar_lea.hbm %s615_s5, 2  ;;  %s620_s9 = scalar_lea.hbm %s823_s3, 4 }
  0x22   : > { %260 = vmatpush.msra.mxu0 %v229_v13  ;;  %496 = vmatpush.msra.mxu3 %v229_v13  ;;  %v310_v31 = vsel %vm307_vm0, %v308_v20, %v309_v21  ;;  %v240_v33 = vsel %vm237_vm1, %v238_v25, %v239_v26  ;;  %v569_v44 = vld [vmem:[%s822_s2] ss:$0 sm:$0xff]  ;;  %p617_p1 = scmp.ne.s32.totalorder %s615_s5, %s616_s6  ;;  %p622_p6 = scmp.lt.s32.totalorder %s620_s9, %s616_s6 }
  0x23   : > { %287 = vmatpush.msra.mxu1 %v220_v15  ;;  %330 = vmatpush.msra.mxu2 %v301_v17  ;;  %v242_v34 = vsel %vm237_vm1, %v239_v26, %v241_v30  ;;  %v312_v36 = vsel %vm307_vm0, %v309_v21, %v311_v35 }
  0x24   : > { %261 = vmatpush.msra.mxu0 %v228_v18  ;;  %497 = vmatpush.msra.mxu3 %v228_v18  ;;  %p618_p2 = pnand %p617_p1, %p747_p4  ;;  %p623_p7 = por %p622_p6, %p621_p5 }
  0x25   : > { %288 = vmatpush.msra.mxu1 %v219_v19  ;;  %331 = vmatpush.msra.mxu2 %v300_v23 }
  0x26   : > { %262 = vmatpush.msra.mxu0 %v227_v24  ;;  %498 = vmatpush.msra.mxu3 %v227_v24  ;;  %p619_p3 = pneg %p618_p2 }
  0x27   : > { %289 = vmatpush.msra.mxu1 %v218_v27  ;;  %332 = vmatpush.msra.mxu2 %v299_v28 }
  0x28   : > { %263 = vmatpush.msra.mxu0 %v226_v29  ;;  %486 = vmatmul.msk.f32.vlgmr.msra.gmra.mxu2 %vm243_vm2, %v310_v31  ;;  %p624_p9 = pnand %p623_p7, %p619_p3 }
  0x29   : > { %290 = vmatpush.msra.mxu1 %v217_v32  ;;  %482 = vmatmul.msk.f32.vlgmr.msra.gmra.mxu0 %vm243_vm2, %v240_v33 }
  0x2a   : > { %484 = vmatmul.msk.f32.vlgmr.msra.gmra.mxu1 %vm243_vm2, %v214_v14  ;;  %499 = vmatpush.msra.mxu3 %v226_v29 }
  0x2b   : > { %483 = vmatmul.msk.f32.vlgmr.msra.gmra.mxu3 %vm243_vm2, %v242_v34 }
  0x30   : > { %487 = vmatmul.msk.f32.gmra.mxu2 %vm243_vm2, %v312_v36 }
  0x32   : > { %485 = vmatmul.msk.f32.gmra.mxu1 %vm243_vm2, %v215_v16 }
  0xa6   : > { %v265_v38 = vpop.f32.mrf.mxu0 }
  0xa7   : > { %v292_v37 = vpop.f32.mrf.mxu1 }
  0xa8   : > { %v293_v40 = vadd.f32 %v292_v37, %v265_v38 }
  0xab   : > { %v334_v39 = vpop.f32.mrf.mxu2 }
  0xac   : > { %v340_v43 = vadd.f32 %v334_v39, %v293_v40 }
  0xae   : > { %v268_v41 = vpop.f32.mrf.mxu3  ;;  %v346_v47 = vadd.f32 %v569_v44, %v340_v43 }
  0xaf   : > { %v295_v42 = vpop.f32.mrf.mxu1 }
  0xb0   : > { %v296_v45 = vadd.f32 %v295_v42, %v268_v41  ;;  %v355_v50 = vmul.f32 %v346_v47, %v346_v47 }
  0xb3   : > { %v337_v46 = vpop.f32.mrf.mxu2 }
  0xb4   : > { %v341_v48 = vadd.f32 %v337_v46, %v296_v45 }
  0xb6   : > { %v347_v49 = vadd.f32 %v569_v44, %v341_v48 }
  0xb8   : > { %v348_v51 = vadd.f32 %v347_v49, %v346_v47  ;;  %v356_v52 = vmul.f32 %v347_v49, %v347_v49 }
  0xba   : > { %v349_v53 = vrot.slane %v348_v51, 4  ;;  %v357_v54 = vadd.f32 %v356_v52, %v355_v50 }
  0xbc   : > { %v350_v55 = vadd.f32 %v349_v53, %v348_v51  ;;  %v358_v56 = vrot.slane %v357_v54, 4 }
  0xbe   : > { %v351_v57 = vrot.slane %v350_v55, 2  ;;  %v359_v58 = vadd.f32 %v358_v56, %v357_v54 }
  0xc0   : > { %v352_v59 = vadd.f32 %v351_v57, %v350_v55  ;;  %v360_v60 = vrot.slane %v359_v58, 2 }
  0xc2   : > { %v353_v61 = vrot.slane %v352_v59, 1  ;;  %v361_v62 = vadd.f32 %v360_v60, %v359_v58 }
  0xc4   : > { %v362_v63 = vrot.slane %v361_v62, 1  ;;  %v354_v0 = vadd.f32 %v353_v61, %v352_v59 }
  0xc6   : > { %v363_v1 = vadd.f32 %v362_v63, %v361_v62 }
  0xc8   : > { %v365_v2 = vsel %vm364_vm3, %v354_v0, %v363_v1 }
  0xc9   : > { %366 = vst [vmem:[%s204_s29] sm:$0x3] %v365_v2 }
  0xca   : > { %627 = shalt.err (!%p624_p9)
}
  0xcb   : > { %505 = dma.vmem_to_hbm [thread:$0]  (%p747_p4), %s382_s30, 32, %s384_s4, %s368_s15  }
  0xcc PF: > { %p517_p10 = scmp.ge.s32.totalorder %s682_s17, 2  ;;  %s395_s18 = sand.u32 1, %s662_s12  }
  0xcd   : > { %s396_s19 = scalar_lea.sflag [#allocation4], %s395_s18 }
  0xce   : > { %p512_p11 = pnand %p517_p10, %p754_p8 }
  0xd0   : > { %p513_p12 = pneg %p512_p11 }
  0xd2   : > { %657 = dma.done.wait (%p513_p12), %s396_s19, 32  }
  0xd3   : > { %659 = vsyncadd (%p513_p12), %s396_s19, 4294967264  ;;  %s17_s17 = sadd.s32 1, %s682_s17   ;;  %s826_s12 = smov %s666_s13 }
  0xd4   : > { %p14_p13 = scmp.ge.s32.totalorder %s17_s17, 4   ;;  %s827_s13 = smov %s670_s14 }
  0xd5   : > { %s828_s14 = smov %s760_s25  ;;  %s829_s15 = smov %s678_s16 }
  0xd6   : > { %s830_s16 = smov %s832_s20  ;;  %16 = sbr.rel (!%p14_p13) target bundleno = 5 (0x5), region = 74 }
  0xdb   :  { %402 = vsyncpa [#allocation3], 1 }
  0xdc   :  { %404 = vsyncpa [#allocation3 + $0x1], 1 }
  0xdd   :  { %405 = vsyncpa [#allocation4], 1 }
  0xde   :  { %407 = vsyncpa [#allocation4 + $0x1], 1 }

</bundles_post_ra>
